<compile_context>
chip_gen: v7x
topology: tpu7x:2x2x1
jax: 0.10.0
libtpu: 0.0.40
codegen_flags: <defaults>
</compile_context>

<pallas_src>
import itertools

import jax
import jax.numpy as jnp
from jax import lax
from jax.experimental import pallas as pl
from jax.experimental.pallas import tpu as pltpu

# ----------------------------- configuration -------------------------------
NUM_SLOTS = 4                      # number of quantum memory slots
B, C, H, W = 8, 4, 8, 8            # state_trace shape (NCHW); B=8 fills sublanes
D = C * H * W                      # flattened trace dimension (256, lane-aligned)
PAIRS = list(itertools.combinations(range(NUM_SLOTS), 2))
P = len(PAIRS)                     # number of (i, j) pairs -> output width
IDX_I = jnp.array([i for (i, _) in PAIRS], dtype=jnp.int32)
IDX_J = jnp.array([j for (_, j) in PAIRS], dtype=jnp.int32)


def _pick_tile_b(bsz: int) -> int:
    """Batch tile: multiple of 8, large enough to amortize per-step overhead,
    >=2 grid steps when possible so the 'parallel' axis can use both v7x TCs."""
    if bsz % 8 != 0:
        return bsz                              # small / ragged batch: one tile
    for t in (512, 256, 128, 64, 32, 16, 8):
        if bsz % t == 0 and bsz // t >= 2:
            return t
    return bsz                                  # e.g. bsz == 8 -> single tile


# ------------------------------ Pallas kernel ------------------------------
def sync_kernel(trace_ref, w_ref, bias_ref, out_ref):
    # trace_ref: (tile_b, D)  flattened state trace tile
    # w_ref:     (P, D)       lane-dense j-column trace-processor weights
    # bias_ref:  (1, P)       folded (linear bias + quantum RY weight), j-gathered
    # out_ref:   (tile_b, P)  sync vector tile
    angles = lax.dot_general(                               # single MXU pass
        trace_ref[...], w_ref[...],
        dimension_numbers=(((1,), (1,)), ((), ())),         # contract over D
        preferred_element_type=jnp.float32) + bias_ref[...]
    s = jnp.sin(0.5 * angles)                               # single EUP push
    out_ref[...] = s * s                                    # P(|1>)_j; one dense store


# ------------------------------- wrappers ------------------------------------
def preprocess_params(proc_w, proc_b, q_weights):
    """One-time parameter preprocessing (hoisted out of the per-call path).

    proc_w:    (NUM_SLOTS, D) stacked Linear(D->1) weights
    proc_b:    (NUM_SLOTS,)   stacked Linear biases
    q_weights: (NUM_SLOTS,)   per-slot quantum RY weight angle
    returns:   w_j (P, D), bias_j (1, P)
    """
    bias = (proc_b + q_weights).astype(jnp.float32)         # fold bias + RY weight
    w_j = proc_w[IDX_J].astype(jnp.float32)                 # (P, D) lane-dense rows
    bias_j = bias[IDX_J][None, :].astype(jnp.float32)       # (1, P)
    return w_j, bias_j


@jax.jit
def quantum_sync_forward(state_trace, w_j, bias_j):
    """state_trace: (B, C, H, W) float32
       w_j:         (P, D)  pre-gathered j-column weights (preprocess_params)
       bias_j:      (1, P)  pre-folded biases
       returns:     (B, P) sync vector, P = NUM_SLOTS*(NUM_SLOTS-1)/2
    """
    bsz = state_trace.shape[0]
    flat = state_trace.reshape(bsz, -1).astype(jnp.float32)  # (B, D)
    d = flat.shape[1]
    p = w_j.shape[0]

    tile_b = _pick_tile_b(bsz)
    grid = (bsz // tile_b,)

    return pl.pallas_call(
        sync_kernel,
        out_shape=jax.ShapeDtypeStruct((bsz, p), jnp.float32),
        grid=grid,
        in_specs=[
            pl.BlockSpec((tile_b, d), lambda b: (b, 0)),     # trace tile
            pl.BlockSpec((p, d), lambda b: (0, 0)),          # j-weights (resident)
            pl.BlockSpec((1, p), lambda b: (0, 0)),          # folded biases
        ],
        out_specs=pl.BlockSpec((tile_b, p), lambda b: (b, 0)),
        compiler_params=pltpu.CompilerParams(
            dimension_semantics=("parallel",)),              # v7x: 2 TCs when >1 step
    )(flat, w_j, bias_j)


# ----------------------------- pure-JAX reference ---------------------------
def reference_forward(state_trace, proc_w, proc_b, q_weights):
    """Full analytic correlation-circuit formula (verifies the simplification)."""
    bsz = state_trace.shape[0]
    flat = state_trace.reshape(bsz, -1)
    angles = flat @ proc_w.T + proc_b[None, :] + q_weights[None, :]   # (B, S)
    p1 = jnp.sin(0.5 * angles) ** 2
    p0 = 1.0 - p1
    cols = [p0[:, i] * p1[:, j] + p1[:, i] * p1[:, j] for (i, j) in PAIRS]
    return jnp.stack(cols, axis=1)


# --------------------------------- main --------------------------------------
if __name__ == "__main__":
    key = jax.random.PRNGKey(0)
    k_trace, k_w, k_b, k_qw = jax.random.split(key, 4)

    state_trace = jax.random.normal(k_trace, (B, C, H, W), dtype=jnp.float32)
    proc_w = 0.05 * jax.random.normal(k_w, (NUM_SLOTS, D), dtype=jnp.float32)
    proc_b = 0.1 * jax.random.normal(k_b, (NUM_SLOTS,), dtype=jnp.float32)
    q_weights = jax.random.normal(k_qw, (NUM_SLOTS,), dtype=jnp.float32)

    # one-time parameter preprocessing (weights only change on update)
    w_j, bias_j = preprocess_params(proc_w, proc_b, q_weights)

    out = jax.block_until_ready(quantum_sync_forward(state_trace, w_j, bias_j))

    ref = reference_forward(state_trace, proc_w, proc_b, q_weights)
    assert out.shape == (B, P), out.shape
    assert jnp.allclose(out, ref, atol=1e-5, rtol=1e-5), (out, ref)

    print("KERNEL_OK")
</pallas_src>

<mosaic_0001>
module attributes {stable_mosaic.version = 11 : i64} {
  func.func @sync_kernel(%arg0: i32, %arg1: memref<8x256xf32, #tpu.memory_space<vmem>>, %arg2: memref<6x256xf32, #tpu.memory_space<vmem>>, %arg3: memref<1x6xf32, #tpu.memory_space<vmem>>, %arg4: memref<8x6xf32, #tpu.memory_space<vmem>>) attributes {dimension_semantics = [#tpu.dimension_semantics<parallel>], iteration_bounds = array<i64: 1>, scalar_prefetch = 0 : i64, scratch_operands = 0 : i64, tpu.core_type = #tpu.core_type<tc>, window_params = [{transform_indices = @transform_0, window_bounds = array<i64: 8, 256>}, {pipeline_mode = #tpu.pipeline_mode<synchronous>, transform_indices = @transform_1, window_bounds = array<i64: 6, 256>}, {pipeline_mode = #tpu.pipeline_mode<synchronous>, transform_indices = @transform_2, window_bounds = array<i64: 1, 6>}, {transform_indices = @transform_3, window_bounds = array<i64: 8, 6>}]} {
    %c0 = arith.constant 0 : index
    %c0_0 = arith.constant 0 : index
    %0 = vector.load %arg1[%c0, %c0_0] : memref<8x256xf32, #tpu.memory_space<vmem>>, vector<8x256xf32>
    %c0_1 = arith.constant 0 : index
    %c0_2 = arith.constant 0 : index
    %1 = vector.load %arg2[%c0_1, %c0_2] : memref<6x256xf32, #tpu.memory_space<vmem>>, vector<6x256xf32>
    %cst = arith.constant dense<0.000000e+00> : vector<8x6xf32>
    %2 = tpu.matmul %0, %1, %cst {dimension_numbers = #tpu.dot_dimension_numbers<[1], [1], [0], [0], [0, 0, 1, 0], [], []>} : vector<8x256xf32>, vector<6x256xf32>, vector<8x6xf32> -> vector<8x6xf32>
    %c0_3 = arith.constant 0 : index
    %c0_4 = arith.constant 0 : index
    %3 = vector.load %arg3[%c0_3, %c0_4] : memref<1x6xf32, #tpu.memory_space<vmem>>, vector<1x6xf32>
    %4 = vector.broadcast %3 : vector<1x6xf32> to vector<8x6xf32>
    %5 = arith.addf %2, %4 : vector<8x6xf32>
    %cst_5 = arith.constant 5.000000e-01 : f32
    %6 = vector.broadcast %cst_5 : f32 to vector<8x6xf32>
    %7 = arith.mulf %6, %5 : vector<8x6xf32>
    %8 = math.sin %7 : vector<8x6xf32>
    %9 = arith.mulf %8, %8 : vector<8x6xf32>
    %c0_6 = arith.constant 0 : index
    %c0_7 = arith.constant 0 : index
    %10 = vector.load %arg4[%c0_6, %c0_7] : memref<8x6xf32, #tpu.memory_space<vmem>>, vector<8x6xf32>
    tpu.vector_store %arg4[%c0_6, %c0_7], %9 {strides = array<i32>} : memref<8x6xf32, #tpu.memory_space<vmem>>, vector<8x6xf32>,
    return
  }
  func.func @transform_0(%arg0: i32) -> (i32, i32) {
    %c0_i32 = arith.constant 0 : i32
    %c0_i32_0 = arith.constant 0 : i32
    return %arg0, %c0_i32 : i32, i32
  }
  func.func @transform_1(%arg0: i32) -> (i32, i32) {
    %c0_i32 = arith.constant 0 : i32
    %c0_i32_0 = arith.constant 0 : i32
    %c0_i32_1 = arith.constant 0 : i32
    return %c0_i32, %c0_i32_0 : i32, i32
  }
  func.func @transform_2(%arg0: i32) -> (i32, i32) {
    %c0_i32 = arith.constant 0 : i32
    %c0_i32_0 = arith.constant 0 : i32
    %c0_i32_1 = arith.constant 0 : i32
    return %c0_i32, %c0_i32_0 : i32, i32
  }
  func.func @transform_3(%arg0: i32) -> (i32, i32) {
    %c0_i32 = arith.constant 0 : i32
    %c0_i32_0 = arith.constant 0 : i32
    return %arg0, %c0_i32 : i32, i32
  }
}

</mosaic_0001>

<bundles_post_ra>
// kernel: quantum_sync_forward.1
= control target key start
LH: loop header
LB: loop body
LE: loop exit
PB: predicated region body
PF: predicated region fallthrough
CT: control target
= control target key end

     0   :  { %s337_s0 = inlined_call_operand.vmem [shape: f32[8,256], index: 0, kind: input, shape index: {}]   ;;  %s338_s1 = inlined_call_operand.vmem [shape: f32[6,256], index: 1, kind: input, shape index: {}]   ;;  %s339_s2 = inlined_call_operand.vmem [shape: f32[1,6], index: 2, kind: input, shape index: {}]   ;;  %s340_s3 = inlined_call_operand.hbm [shape: f32[8,6], index: 3, kind: output, shape index: {}]  }
   0x1   :  { %v18_v0 = vld [vmem:[%s338_s1 + $0x8] sm:$0x3f]  ;;  %v17_v1 = vld [vmem:[%s338_s1] sm:$0x3f] }
   0x2   :  { %v16_v2 = vld [vmem:[%s337_s0 + $0x8] sm:$0xff]  ;;  %26 = vmatprep.subr.mxu0 %v18_v0 }
   0x3   :  { %90 = vmatprep.mubr.f32.mxu0 %v16_v2 }
   0x4   :  { %8 = vsyncpa [#allocation3], 0  ;;  %27 = vmatpush1.xpose.msra.mxu0 %v17_v1  ;;  %v15_v3 = vld [vmem:[%s337_s0] sm:$0xff]  ;;  %v262_v19 = vmov 683565275   ;;  %s268_s0 = smov [#allocation2]  }
   0x5   :  { %v218_v4 = vld [vmem:[%s339_s2] ss:$0 sm:$0xff]  ;;  %v263_v21 = vmov 2475754826   ;;  %v264_v24 = vmov 2131351028  }
   0x6   :  { %v265_v27 = vmov 2102212464   ;;  %v266_v30 = vmov 920167782   ;;  %v267_v33 = vmov 1326507024  }
   0x7   :  { %91 = vmatmul.mubr.f32.vlgmr.msra.gmra.mrb[0].mxu0 %v15_v3  ;;  %s210_s1 = sshll.u32 %s268_s0, 4  ;;  %vm202_vm13 = vcmask 48128   ;;  %s211_s1 = int_to_ptr.vmem [resolvable:$true] %s210_s1 }
   0x8   :  { %s238_s2 = scalar_lea.vmem %s211_s1, 128  ;;  %p243_p1 = scmp.lt.s32.totalorder %s211_s1, %s211_s1 }
   0x9   :  { %p239_p0 = scmp.ne.s32.totalorder %s211_s1, %s238_s2  ;;  %p244_p2 = scmp.lt.s32.totalorder %s238_s2, %s238_s2 }
   0xb   :  { %p245_p3 = por %p244_p2, %p243_p1 }
   0xd   :  { %p246_p4 = pnand %p245_p3, %p239_p0 }
  0xda   :  { %v92_v5 = vpop.f32.mrb[0].mxu0 }
  0xdb   :  { %v93_v6 = vadd.f32 %v218_v4, %v92_v5  ;;  %v94_v7 = vpop.f32.mrb[1].mxu0 }
  0xdd   :  { %v304_v8 = vmul.f32 0.5, %v93_v6 }
  0xdf   :  { %v100_v9 = vand.u32 2139095040, %v304_v8  ;;  %v97_v13 = vand.u32 2147483647, %v304_v8  ;;  %vm99_vm7 = vcmp.lt.s32.totalorder %v304_v8, 0  ;;  %vm189_vm12 = vweird.f32 %v304_v8 }
  0xe1   :  { %v101_v10 = vshrl.u32 %v100_v9, 23  ;;  %v104_v16 = vand.u32 8388607, %v97_v13  ;;  %vm98_vm8 = vcmp.le.f32.partialorder %v97_v13, 0.7853982 }
  0xe3   :  { %v219_v11 = vadd.s32 4294967169, %v101_v10  ;;  %v105_v35 = vor.u32 8388608, %v104_v16 }
  0xe5   :  { %v107_v12 = vadd.s32 1, %v219_v11  ;;  %v145_v49 = vshll.u32 %v105_v35, 8 }
  0xe7   :  { %vm108_vm0 = vcmp.gt.s32.totalorder %v107_v12, 0 }
  0xe8   :  { %v109_v14 = vsel %vm108_vm0, %v107_v12, 0 }
  0xe9   :  { %v111_v15 = vand.u32 31, %v109_v14  ;;  %v110_v18 = vshrl.u32 %v109_v14, 5 }
  0xeb   :  { %v112_v17 = vsub.s32 32, %v111_v15  ;;  %v114_v20 = vshll.u32 %v262_v19, %v111_v15  ;;  %v117_v22 = vshll.u32 %v263_v21, %v111_v15  ;;  %v120_v26 = vshll.u32 %v264_v24, %v111_v15 }
  0xec   :  { %v123_v29 = vshll.u32 %v265_v27, %v111_v15  ;;  %v126_v32 = vshll.u32 %v266_v30, %v111_v15  ;;  %vm129_vm1 = vcmp.lt.s32.totalorder %v110_v18, 1  ;;  %vm132_vm2 = vcmp.lt.s32.totalorder %v110_v18, 4 }
  0xed   :  { %v115_v23 = vshrl.u32 %v263_v21, %v112_v17  ;;  %v118_v25 = vshrl.u32 %v264_v24, %v112_v17  ;;  %v121_v28 = vshrl.u32 %v265_v27, %v112_v17  ;;  %v124_v31 = vshrl.u32 %v266_v30, %v112_v17 }
  0xee   :  { %v127_v34 = vshrl.u32 %v267_v33, %v112_v17  ;;  %v113_v44 = vshrl.u32 %v262_v19, %v112_v17  ;;  %vm131_vm3 = vcmp.lt.s32.totalorder %v110_v18, 3  ;;  %vm130_vm4 = vcmp.lt.s32.totalorder %v110_v18, 2 }
  0xef   :  { %v116_v36 = vor.u32 %v115_v23, %v114_v20  ;;  %v119_v37 = vor.u32 %v118_v25, %v117_v22  ;;  %v122_v38 = vor.u32 %v121_v28, %v120_v26  ;;  %v125_v39 = vor.u32 %v124_v31, %v123_v29 }
  0xf0   :  { %v128_v40 = vor.u32 %v127_v34, %v126_v32 }
  0xf1   :  { %v134_v41 = vsel %vm132_vm2, %v122_v38, 2102212464  ;;  %v137_v42 = vsel %vm129_vm1, %v116_v36, %v119_v37  ;;  %v141_v43 = vsel %vm129_vm1, %v119_v37, %v122_v38  ;;  %v138_v45 = vsel %vm132_vm2, %v125_v39, 920167782 }
  0xf2   :  { %v142_v46 = vsel %vm132_vm2, %v128_v40, 1326507024  ;;  %v139_v47 = vsel %vm131_vm3, %v122_v38, %v138_v45  ;;  %v133_v50 = vsel %vm129_vm1, %v113_v44, %v116_v36  ;;  %v135_v51 = vsel %vm131_vm3, %v119_v37, %v134_v41 }
  0xf3   :  { %v143_v48 = vsel %vm131_vm3, %v125_v39, %v142_v46  ;;  %v140_v52 = vsel %vm130_vm4, %v137_v42, %v139_v47  ;;  %v136_v58 = vsel %vm130_vm4, %v133_v50, %v135_v51 }
  0xf4   :  { %v144_v53 = vsel %vm130_vm4, %v141_v43, %v143_v48  ;;  %v313_v56 = vmul.u32.u64.low %v145_v49, %v140_v52  ;;  %v314_v57 = vmul.u32.u64.high %v145_v49, %v140_v52, %v313_v56  ;;  %v152_v60 = vmul.u32 %v145_v49, %v136_v58 }
  0xf5   :  { %v310_v54 = vmul.u32.u64.low %v145_v49, %v144_v53  ;;  %v311_v55 = vmul.u32.u64.high %v145_v49, %v144_v53, %v310_v54 }
  0xf6   :  { %v155_v59 = vadd.s32 1, %v314_v57 }
  0xf7   :  { %vm154_vm5 = vc.u32 %v311_v55, %v313_v56  ;;  %v153_v9 = vadd.s32 %v313_v56, %v311_v55 }
  0xf8   :  { %v156_v61 = vsel %vm154_vm5, %v155_v59, %v314_v57 }
  0xf9   :  { %v157_v62 = vadd.s32 %v156_v61, %v152_v60 }
  0xfb   :  { %v158_v63 = vadd.s32 536870912, %v157_v62 }
  0xfd   :  { %v159_v0 = vshrl.u32 %v158_v63, 30 }
  0xff   :  { %v160_v1 = vshll.u32 %v159_v0, 30  ;;  %v183_v22 = vsub.s32 4, %v159_v0 }
 0x101   :  { %v161_v2 = vsub.s32 %v157_v62, %v160_v1  ;;  %v184_v25 = vsel %vm99_vm7, %v183_v22, %v159_v0 }
 0x102   :  { %v186_v27 = vsel %vm98_vm8, 0, %v184_v25 }
 0x103   :  { %v163_v3 = vsub.s32 0, %v161_v2  ;;  %v190_v28 = vadd.s32 3, %v186_v27 }
 0x105   :  { %v220_v4 = vmin.u32 %v163_v3, %v161_v2  ;;  %v191_v29 = vand.u32 3, %v190_v28 }
 0x107   :  { %v165_v5 = vclz %v220_v4  ;;  %vm196_vm9 = vcmp.eq.s32.totalorder %v191_v29, 2  ;;  %vm193_vm10 = vcmp.eq.s32.totalorder %v191_v29, 0  ;;  %vm192_vm11 = vcmp.lt.s32.totalorder %v191_v29, 2 }
 0x109   :  { %v221_v6 = vadd.s32 4294967294, %v165_v5 }
 0x10b   :  { %vm222_vm6 = vcmp.lt.s32.totalorder %v221_v6, 0 }
 0x10c   :  { %v168_v7 = vsel %vm222_vm6, 0, %v221_v6 }
 0x10d   :  { %v169_v10 = vsub.s32 32, %v168_v7  ;;  %v173_v11 = vsub.s32 4294967266, %v168_v7  ;;  %v170_v12 = vshll.u32 %v161_v2, %v168_v7 }
 0x10f   :  { %v171_v14 = vshrl.u32 %v153_v9, %v169_v10  ;;  %v174_v15 = vadd.s32 127, %v173_v11 }
 0x111   :  { %v172_v16 = vor.u32 %v171_v14, %v170_v12  ;;  %v175_v17 = vshll.u32 %v174_v15, 23 }
 0x113   :  { %v176_v18 = vor.u32 4788187, %v175_v17  ;;  %v179_v20 = vcvt.s32.f32 %v172_v16 }
 0x115   :  { %v177_v19 = vand.u32 2147483647, %v176_v18 }
 0x117   :  { %v180_v21 = vmul.f32 %v179_v20, %v177_v19 }
 0x119   :  { %v181_v23 = vxor.u32 2147483648, %v180_v21 }
 0x11b   :  { %v182_v24 = vsel %vm99_vm7, %v181_v23, %v180_v21 }
 0x11c   :  { %v185_v26 = vsel %vm98_vm8, %v304_v8, %v182_v24 }
 0x11d   :  { %234 = vcosq.f32 %v185_v26 }
 0x11e   :  { %236 = vsinq.f32 %v185_v26 }
 0x127   :  { %v235_v30 = vpop.eup %234 }
 0x128   :  { %v237_v31 = vpop.eup %236  ;;  %v197_v32 = vxor.u32 2147483648, %v235_v30 }
 0x129   :  { %v194_v33 = vxor.u32 2147483648, %v237_v31 }
 0x12a   :  { %v198_v34 = vsel %vm196_vm9, %v197_v32, %v237_v31 }
 0x12b   :  { %v195_v35 = vsel %vm193_vm10, %v235_v30, %v194_v33 }
 0x12c   :  { %v199_v13 = vsel %vm192_vm11, %v195_v35, %v198_v34 }
 0x12d   :  { %v200_v36 = vsel %vm189_vm12, nan, %v199_v13 }
 0x12e   :  { %v201_v37 = vmul.f32 %v200_v36, %v200_v36 }
 0x130   :  { %203 = vst.msk [vmem:[#allocation2] sm:$0xff] %vm202_vm13, %v201_v37 }
 0x131   :  { %249 = shalt.err (!%p246_p4)
}
 0x132   :  { %s250_s24 = scalar_lea.hbm %s340_s3, 128 }
 0x133   :  { %p251_p5 = scmp.ne.s32.totalorder %s340_s3, %s250_s24  ;;  %p254_p6 = scmp.lt.u32.totalorder %s250_s24, %s340_s3 }
 0x135   :  { %p256_p7 = pnand %p254_p6, %p251_p5 }
 0x137   :  { %259 = shalt.err (!%p256_p7)
}
 0x138   :  { %213 = dma.vmem_to_hbm [thread:$0]  %s211_s1, 128, %s340_s3, [#allocation3]  }
 0x139   :  { %260 = dma.done.wait [#allocation3], 128  }
 0x13a   :  { %261 = vsyncadd [#allocation3], 4294967168 }
 0x13b   :  { %217 = vsyncpa [#allocation3], 1 }

</bundles_post_ra>
